<compile_context>
chip_gen: v7x
topology: tpu7x:2x2x1
jax: 0.10.0
libtpu: 0.0.40
codegen_flags: <defaults>
</compile_context>

<pallas_src>
import functools

import jax
import jax.numpy as jnp
from jax.experimental import pallas as pl
from jax.experimental.pallas import tpu as pltpu

_DEFAULT_BLOCK_BYTES = 4 * 1024 * 1024  # per input block; x2 for double buffering


def _round_up(x, m):
    return ((x + m - 1) // m) * m


def _choose_tiles(rows, hw, itemsize, block_bytes=_DEFAULT_BLOCK_BYTES):
    """Pick (row_tile, hw_tile) so one input block is <= block_bytes."""
    sub = max(8, 32 // itemsize)            # sublane tile: 8 f32, 16 bf16, 32 int8
    rows_pad = _round_up(rows, sub)
    if sub * hw * itemsize <= block_bytes:
        # A full-width slab fits: no tiling of the reduction axis needed.
        hw_tile = hw
        row_tile = min(1024, (block_bytes // (hw * itemsize)) // sub * sub, rows_pad)
        row_tile = max(sub, row_tile)
    else:
        # Huge feature map: tile H*W (multiple of 128) so rows stay blocked.
        row_tile = min(256, rows_pad)
        hw_tile = max(128, (block_bytes // (row_tile * itemsize)) // 128 * 128)
    return row_tile, hw_tile


def _mean_max_kernel(x_ref, o_ref, sum_acc, max_acc, *, hw, hw_tile, mask_lanes):
    # Grid = (row blocks [parallel], hw blocks [arbitrary / reduction, innermost]).
    k = pl.program_id(1)

    @pl.when(k == 0)
    def _init():
        sum_acc[...] = jnp.zeros_like(sum_acc)
        max_acc[...] = jnp.full_like(max_acc, -jnp.inf)

    x = x_ref[...].astype(jnp.float32)

    if mask_lanes:
        # Last hw block is partial: mask out-of-bounds lanes (0 for the sum,
        # -inf for the max) so garbage never leaks into kept rows.
        lane = jax.lax.broadcasted_iota(jnp.int32, x.shape, 1)
        valid = (k * hw_tile + lane) < hw
        x_sum = jnp.where(valid, x, 0.0)
        x_max = jnp.where(valid, x, -jnp.inf)
    else:
        x_sum = x
        x_max = x

    sum_acc[...] = sum_acc[...] + jnp.sum(x_sum, axis=-1, keepdims=True)
    max_acc[...] = jnp.maximum(max_acc[...], jnp.max(x_max, axis=-1, keepdims=True))

    @pl.when(k == pl.num_programs(1) - 1)
    def _finalize():
        # Divide by the true H*W (not the padded lane count).
        o_ref[...] = (sum_acc[...] / hw + max_acc[...]).astype(o_ref.dtype)


@functools.partial(jax.jit, static_argnames=("row_tile", "hw_tile"))
def mean_max_pooling(x, row_tile=None, hw_tile=None):
    """MeanMaxPooling with output_size=(1, 1).

    x: NCHW array (B, C, H, W). Returns (B, C, 1, 1), same dtype as x.
    """
    B, C, H, W = x.shape
    rows = B * C
    hw = H * W
    itemsize = jnp.dtype(x.dtype).itemsize

    auto_row, auto_hw = _choose_tiles(rows, hw, itemsize)
    if row_tile is None:
        row_tile = auto_row
    if hw_tile is None:
        hw_tile = auto_hw

    x2 = x.reshape(rows, hw)  # free view, no HBM copy (and no pad copy)

    grid = (pl.cdiv(rows, row_tile), pl.cdiv(hw, hw_tile))
    kernel = functools.partial(
        _mean_max_kernel, hw=hw, hw_tile=hw_tile, mask_lanes=(hw % hw_tile != 0)
    )

    out = pl.pallas_call(
        kernel,
        out_shape=jax.ShapeDtypeStruct((rows, 1), x.dtype),
        grid_spec=pltpu.PrefetchScalarGridSpec(
            num_scalar_prefetch=0,
            grid=grid,
            in_specs=[pl.BlockSpec((row_tile, hw_tile), lambda i, k: (i, k))],
            out_specs=pl.BlockSpec((row_tile, 1), lambda i, k: (i, 0)),
            scratch_shapes=[
                pltpu.VMEM((row_tile, 1), jnp.float32),  # running sum
                pltpu.VMEM((row_tile, 1), jnp.float32),  # running max
            ],
        ),
        compiler_params=pltpu.CompilerParams(
            dimension_semantics=("parallel", "arbitrary"),
            vmem_limit_bytes=32 * 1024 * 1024,
        ),
    )(x2)

    return out.reshape(B, C, 1, 1)


def _reference(x):
    # Pure-JAX reference matching the PyTorch module with output_size=(1,1).
    xf = x.astype(jnp.float32)
    mean = jnp.mean(xf, axis=(2, 3), keepdims=True)
    mx = jnp.max(xf, axis=(2, 3), keepdims=True)
    return (mean + mx).astype(x.dtype)


def _check(x, row_tile=None, hw_tile=None, atol=1e-5, rtol=1e-5):
    out = jax.block_until_ready(
        mean_max_pooling(x, row_tile=row_tile, hw_tile=hw_tile)
    )
    ref = _reference(x)
    assert out.shape == ref.shape, (out.shape, ref.shape)
    assert out.dtype == x.dtype, out.dtype
    of = out.astype(jnp.float32)
    rf = ref.astype(jnp.float32)
    assert jnp.allclose(of, rf, atol=atol, rtol=rtol), jnp.max(jnp.abs(of - rf))
    return out


if __name__ == "__main__":
    key = jax.random.PRNGKey(0)
    k0, k1, k2, k3 = jax.random.split(key, 4)

    # Primary small case (NCHW global mean+max pooling).
    x0 = jax.random.normal(k0, (2, 4, 16, 16), dtype=jnp.float32)
    _check(x0)

    # Non-divisible rows (B*C = 15) and tiny spatial (H*W = 49): partial edge
    # row block, no pad copy.
    x1 = jax.random.normal(k1, (3, 5, 7, 7), dtype=jnp.float32)
    _check(x1)

    # bfloat16 input (f32 accumulation inside the kernel).
    x2 = jax.random.normal(k2, (2, 4, 8, 16), dtype=jnp.bfloat16)
    _check(x2, atol=2e-2, rtol=2e-2)

    # Force the H*W-tiled accumulator path at small shapes:
    _check(x0, hw_tile=128)   # hw = 256 -> two full lane blocks
    x3 = jax.random.normal(k3, (1, 3, 10, 20), dtype=jnp.float32)
    _check(x3, hw_tile=128)   # hw = 200 -> partial lane block, masked

    print("KERNEL_OK")
</pallas_src>

<mosaic_0001>
module attributes {stable_mosaic.version = 11 : i64} {
  func.func @_mean_max_kernel(%arg0: i32, %arg1: i32, %arg2: memref<8x256xf32, #tpu.memory_space<vmem>>, %arg3: memref<8x1xf32, #tpu.memory_space<vmem>>, %arg4: memref<8x1xf32, #tpu.memory_space<vmem>>, %arg5: memref<8x1xf32, #tpu.memory_space<vmem>>) attributes {dimension_semantics = [#tpu.dimension_semantics<parallel>, #tpu.dimension_semantics<arbitrary>], iteration_bounds = array<i64: 1, 1>, scalar_prefetch = 0 : i64, scratch_operands = 2 : i64, tpu.core_type = #tpu.core_type<tc>, window_params = [{transform_indices = @transform_0, window_bounds = array<i64: 8, 256>}, {transform_indices = @transform_1, window_bounds = array<i64: 8, 1>}]} {
    %c0_i32 = arith.constant 0 : i32
    %0 = arith.cmpi eq, %arg1, %c0_i32 : i32
    %1 = arith.extui %0 : i1 to i32
    %c0_i32_0 = arith.constant 0 : i32
    %2 = arith.cmpi ne, %1, %c0_i32_0 : i32
    scf.if %2 {
      %cst_13 = arith.constant 0.000000e+00 : f32
      %17 = vector.broadcast %cst_13 : f32 to vector<8x1xf32>
      %c0_14 = arith.constant 0 : index
      %c0_15 = arith.constant 0 : index
      %18 = vector.load %arg4[%c0_14, %c0_15] : memref<8x1xf32, #tpu.memory_space<vmem>>, vector<8x1xf32>
      tpu.vector_store %arg4[%c0_14, %c0_15], %17 {strides = array<i32>} : memref<8x1xf32, #tpu.memory_space<vmem>>, vector<8x1xf32>,
      %cst_16 = arith.constant 0xFF800000 : f32
      %19 = vector.broadcast %cst_16 : f32 to vector<8x1xf32>
      %c0_17 = arith.constant 0 : index
      %c0_18 = arith.constant 0 : index
      %20 = vector.load %arg5[%c0_17, %c0_18] : memref<8x1xf32, #tpu.memory_space<vmem>>, vector<8x1xf32>
      tpu.vector_store %arg5[%c0_17, %c0_18], %19 {strides = array<i32>} : memref<8x1xf32, #tpu.memory_space<vmem>>, vector<8x1xf32>,
    } else {
    }
    %c0 = arith.constant 0 : index
    %c0_1 = arith.constant 0 : index
    %3 = vector.load %arg2[%c0, %c0_1] : memref<8x256xf32, #tpu.memory_space<vmem>>, vector<8x256xf32>
    %c0_2 = arith.constant 0 : index
    %c0_3 = arith.constant 0 : index
    %4 = vector.load %arg4[%c0_2, %c0_3] : memref<8x1xf32, #tpu.memory_space<vmem>>, vector<8x1xf32>
    %cst = arith.constant dense<0.000000e+00> : vector<8xf32>
    %5 = vector.multi_reduction <add>, %3, %cst [1] : vector<8x256xf32> to vector<8xf32>
    %6 = vector.shape_cast %5 : vector<8xf32> to vector<8x1xf32>
    %7 = arith.addf %4, %6 : vector<8x1xf32>
    %c0_4 = arith.constant 0 : index
    %c0_5 = arith.constant 0 : index
    %8 = vector.load %arg4[%c0_4, %c0_5] : memref<8x1xf32, #tpu.memory_space<vmem>>, vector<8x1xf32>
    tpu.vector_store %arg4[%c0_4, %c0_5], %7 {strides = array<i32>} : memref<8x1xf32, #tpu.memory_space<vmem>>, vector<8x1xf32>,
    %c0_6 = arith.constant 0 : index
    %c0_7 = arith.constant 0 : index
    %9 = vector.load %arg5[%c0_6, %c0_7] : memref<8x1xf32, #tpu.memory_space<vmem>>, vector<8x1xf32>
    %cst_8 = arith.constant dense<0xFF800000> : vector<8xf32>
    %10 = vector.multi_reduction <maximumf>, %3, %cst_8 [1] : vector<8x256xf32> to vector<8xf32>
    %11 = vector.shape_cast %10 : vector<8xf32> to vector<8x1xf32>
    %12 = arith.maximumf %9, %11 : vector<8x1xf32>
    %c0_9 = arith.constant 0 : index
    %c0_10 = arith.constant 0 : index
    %13 = vector.load %arg5[%c0_9, %c0_10] : memref<8x1xf32, #tpu.memory_space<vmem>>, vector<8x1xf32>
    tpu.vector_store %arg5[%c0_9, %c0_10], %12 {strides = array<i32>} : memref<8x1xf32, #tpu.memory_space<vmem>>, vector<8x1xf32>,
    %c0_i32_11 = arith.constant 0 : i32
    %14 = arith.cmpi eq, %arg1, %c0_i32_11 : i32
    %15 = arith.extui %14 : i1 to i32
    %c0_i32_12 = arith.constant 0 : i32
    %16 = arith.cmpi ne, %15, %c0_i32_12 : i32
    scf.if %16 {
      %c0_13 = arith.constant 0 : index
      %c0_14 = arith.constant 0 : index
      %17 = vector.load %arg4[%c0_13, %c0_14] : memref<8x1xf32, #tpu.memory_space<vmem>>, vector<8x1xf32>
      %cst_15 = arith.constant 2.560000e+02 : f32
      %18 = vector.broadcast %cst_15 : f32 to vector<8x1xf32>
      %19 = arith.divf %17, %18 : vector<8x1xf32>
      %c0_16 = arith.constant 0 : index
      %c0_17 = arith.constant 0 : index
      %20 = vector.load %arg5[%c0_16, %c0_17] : memref<8x1xf32, #tpu.memory_space<vmem>>, vector<8x1xf32>
      %21 = arith.addf %19, %20 : vector<8x1xf32>
      %c0_18 = arith.constant 0 : index
      %c0_19 = arith.constant 0 : index
      %22 = vector.load %arg3[%c0_18, %c0_19] : memref<8x1xf32, #tpu.memory_space<vmem>>, vector<8x1xf32>
      tpu.vector_store %arg3[%c0_18, %c0_19], %21 {strides = array<i32>} : memref<8x1xf32, #tpu.memory_space<vmem>>, vector<8x1xf32>,
    } else {
    }
    return
  }
  func.func @transform_0(%arg0: i32, %arg1: i32) -> (i32, i32) {
    %c0_i32 = arith.constant 0 : i32
    return %arg0, %arg1 : i32, i32
  }
  func.func @transform_1(%arg0: i32, %arg1: i32) -> (i32, i32) {
    %c0_i32 = arith.constant 0 : i32
    %c0_i32_0 = arith.constant 0 : i32
    return %arg0, %c0_i32 : i32, i32
  }
}

</mosaic_0001>

<bundles_post_ra>
// kernel: mean_max_pooling.1
= control target key start
LH: loop header
LB: loop body
LE: loop exit
PB: predicated region body
PF: predicated region fallthrough
CT: control target
= control target key end

     0   :  { %vm12_vm0 = vcmask 7168   ;;  %v45_v2 = vmov 0.0   ;;  %v46_v5 = vmov -inf   ;;  %s71_s0 = inlined_call_operand.vmem [shape: f32[8,256], index: 0, kind: input, shape index: {}]   ;;  %s72_s1 = inlined_call_operand.vmem [shape: f32[8,1], index: 1, kind: output, shape index: {}]  }
   0x1   :  { %v15_v0 = vld [vmem:[%s71_s0] sm:$0xff]  ;;  %v16_v1 = vld [vmem:[%s71_s0 + $0x8] sm:$0xff]  ;;  %13 = vst.msk [vmem:[#allocation2] sm:$0xff] %vm12_vm0, %v45_v2  ;;  %14 = vst.msk [vmem:[#allocation3] sm:$0xff] %vm12_vm0, %v46_v5 }
   0x2   :  { %v18_v3 = vadd.f32 %v16_v1, %v15_v0  ;;  %v25_v4 = vmax.f32 %v15_v0, %v16_v1 }
   0x4   :  { %19 = vadd.xlane.f32.xlu0 %v18_v3 }
   0x8   :  { %26 = vmax.xlane.f32.xlu0 %v25_v4  ;;  %v17_v6 = vld [vmem:[#allocation2] sm:$0xff]  ;;  %v24_v9 = vld [vmem:[#allocation3] sm:$0xff] }
  0x91   :  { %v20_v7 = vpop.xlane.xlu0 %19 }
  0x92   :  { %v21_v8 = vadd.f32 %v20_v7, %v17_v6 }
  0x94   :  { %23 = vst.msk [vmem:[#allocation2] sm:$0xff] %vm12_vm0, %v21_v8 }
  0x95   :  { %v27_v10 = vpop.xlane.xlu0 %26 }
  0x96   :  { %v28_v11 = vmax.f32 %v24_v9, %v27_v10 }
  0x98   :  { %29 = vst.msk [vmem:[#allocation3] sm:$0xff] %vm12_vm0, %v28_v11 }
  0x9b   :  { %v33_v12 = vld [vmem:[#allocation2] sm:$0xff] }
  0x9c   :  { %v35_v13 = vmul.f32 0.00390625, %v33_v12 }
  0x9f   :  { %v36_v14 = vld [vmem:[#allocation3] sm:$0xff] }
  0xa0   :  { %v37_v15 = vadd.f32 %v36_v14, %v35_v13 }
  0xa2   :  { %38 = vst.msk [vmem:[%s72_s1] sm:$0xff] %vm12_vm0, %v37_v15 }

</bundles_post_ra>
